<compile_context>
chip_gen: v7x
topology: tpu7x:2x2x1
jax: 0.10.0
libtpu: 0.0.40
codegen_flags: <defaults>
</compile_context>

<pallas_src>
import jax
import jax.numpy as jnp
from jax.experimental import pallas as pl
from jax.experimental.pallas import tpu as pltpu


def _fusion_kernel(means_ref, logvars_ref, w1_ref, b1_ref, w2t_ref, b2_ref,
                   out_ref):
    # means_ref / logvars_ref: (S, TB, H) for one batch tile (scale-major).
    S = means_ref.shape[0]
    w1 = w1_ref[...]     # (H, 32)
    b1 = b1_ref[...]     # (1, 32)
    w2t = w2t_ref[...]   # (1, 32)  == W2 transposed
    b2 = b2_ref[...]     # (1, 1)

    means = []
    z = []
    # S is small and static: unroll over scales (leading-dim reads are cheap).
    for s in range(S):
        m = means_ref[s].astype(jnp.float32)        # (TB, H)
        lv = logvars_ref[s].astype(jnp.float32)     # (TB, H)

        # attention MLP layer 1: one well-shaped MXU matmul per scale
        h = jnp.dot(m, w1, preferred_element_type=jnp.float32) + b1
        h = jnp.maximum(h, 0.0)                     # (TB, 32)

        # layer 2 (out_features=1): VPU multiply + XLU lane reduce
        score = jnp.sum(h * w2t, axis=-1, keepdims=True) + b2       # (TB, 1)

        # uncertainty = exp(logvar).mean over hidden dim
        uncert = jnp.mean(jnp.exp(lv), axis=-1, keepdims=True)      # (TB, 1)

        means.append(m)
        z.append(score / (uncert + 1e-6))

    # numerically-stable softmax over the scale axis (unrolled elementwise)
    zmax = z[0]
    for s in range(1, S):
        zmax = jnp.maximum(zmax, z[s])
    e = [jnp.exp(zs - zmax) for zs in z]
    denom = e[0]
    for s in range(1, S):
        denom = denom + e[s]
    inv = 1.0 / denom                                # (TB, 1)

    # weighted fusion over scales -> dense (TB, H) store
    fused = (e[0] * inv) * means[0]
    for s in range(1, S):
        fused = fused + (e[s] * inv) * means[s]
    out_ref[...] = fused.astype(out_ref.dtype)


def _pick_batch_tile(batch, tb_max=512):
    """Batch-tile size: multiple of 8 when tiling; >= 2 grid steps when possible."""
    if batch <= 8:
        return batch                       # block dim equals the full array dim
    half = (batch + 1) // 2                # aim for >= 2 tiles (v7x has 2 TCs)
    return min(tb_max, ((half + 7) // 8) * 8)


def prob_scale_fusion(latent_means, latent_logvars, w1, b1, w2, b2,
                      tb_max=512):
    """latent_means / latent_logvars: lists (len S) of (B, H). Returns (B, H)."""
    means = jnp.stack(latent_means, axis=0)      # (S, B, H)  scale-major
    logvars = jnp.stack(latent_logvars, axis=0)  # (S, B, H)
    S, B, H = means.shape

    tb = _pick_batch_tile(B, tb_max)
    n_tiles = pl.cdiv(B, tb)
    b_pad = n_tiles * tb
    if b_pad != B:
        pad = ((0, 0), (0, b_pad - B), (0, 0))
        means = jnp.pad(means, pad)
        logvars = jnp.pad(logvars, pad)

    w2t = w2.reshape(1, 32)   # second Linear as VPU mul + lane reduce

    itemsize = jnp.dtype(means.dtype).itemsize
    cost = pl.CostEstimate(
        flops=2 * b_pad * S * H * 32 + 6 * b_pad * S * H,
        transcendentals=b_pad * S * H + b_pad * S,
        bytes_accessed=(2 * b_pad * S * H + b_pad * H) * itemsize
        + (H * 32 + 32 + 32 + 1) * 4,
    )

    out = pl.pallas_call(
        _fusion_kernel,
        out_shape=jax.ShapeDtypeStruct((b_pad, H), means.dtype),
        grid_spec=pltpu.PrefetchScalarGridSpec(
            num_scalar_prefetch=0,
            grid=(n_tiles,),
            in_specs=[
                pl.BlockSpec((S, tb, H), lambda i: (0, i, 0)),   # means
                pl.BlockSpec((S, tb, H), lambda i: (0, i, 0)),   # logvars
                pl.BlockSpec((H, 32), lambda i: (0, 0)),         # W1
                pl.BlockSpec((1, 32), lambda i: (0, 0)),         # b1
                pl.BlockSpec((1, 32), lambda i: (0, 0)),         # W2^T
                pl.BlockSpec((1, 1), lambda i: (0, 0)),          # b2
            ],
            out_specs=pl.BlockSpec((tb, H), lambda i: (i, 0)),
        ),
        compiler_params=pltpu.CompilerParams(
            dimension_semantics=("parallel",),
            vmem_limit_bytes=32 * 1024 * 1024,
        ),
        cost_estimate=cost,
    )(means, logvars, w1, b1, w2t, b2)
    return out[:B]


def _reference(latent_means, latent_logvars, w1, b1, w2, b2):
    means_stack = jnp.stack(latent_means, axis=1)      # (B, S, H)
    logvars_stack = jnp.stack(latent_logvars, axis=1)  # (B, S, H)
    B, S, H = means_stack.shape
    x = means_stack.reshape(-1, H)
    h = jnp.maximum(x @ w1 + b1[0], 0.0)
    scores = (h @ w2 + b2[0]).reshape(B, S, 1)
    uncert = jnp.mean(jnp.exp(logvars_stack), axis=-1, keepdims=True)
    weights = jax.nn.softmax(scores / (uncert + 1e-6), axis=1)
    return jnp.sum(weights * means_stack, axis=1)


if __name__ == "__main__":
    batch, hidden_dim, num_scales = 2, 32, 3

    key = jax.random.PRNGKey(0)
    k_means, k_logvars, kw1, kb1, kw2, kb2 = jax.random.split(key, 6)

    # Inputs: lists of (B, H) tensors, one per scale (as the module expects).
    latent_means = list(
        jax.random.normal(k_means, (num_scales, batch, hidden_dim),
                          dtype=jnp.float32))
    latent_logvars = list(
        0.1 * jax.random.normal(k_logvars, (num_scales, batch, hidden_dim),
                                dtype=jnp.float32))

    # Deterministic parameter init (PyTorch-Linear-style uniform bounds).
    bound1 = 1.0 / (hidden_dim ** 0.5)
    w1 = jax.random.uniform(kw1, (hidden_dim, 32), jnp.float32, -bound1, bound1)
    b1 = jax.random.uniform(kb1, (1, 32), jnp.float32, -bound1, bound1)
    bound2 = 1.0 / (32.0 ** 0.5)
    w2 = jax.random.uniform(kw2, (32, 1), jnp.float32, -bound2, bound2)
    b2 = jax.random.uniform(kb2, (1, 1), jnp.float32, -bound2, bound2)

    fused = prob_scale_fusion(latent_means, latent_logvars, w1, b1, w2, b2)
    fused = jax.block_until_ready(fused)

    ref = _reference(latent_means, latent_logvars, w1, b1, w2, b2)
    assert fused.shape == (batch, hidden_dim)
    assert jnp.allclose(fused, ref, atol=1e-5, rtol=1e-5), (
        "mismatch vs reference")

    print("KERNEL_OK")
</pallas_src>

<mosaic_0001>
module attributes {stable_mosaic.version = 11 : i64} {
  func.func @_fusion_kernel(%arg0: i32, %arg1: memref<3x2x32xf32, #tpu.memory_space<vmem>>, %arg2: memref<3x2x32xf32, #tpu.memory_space<vmem>>, %arg3: memref<32x32xf32, #tpu.memory_space<vmem>>, %arg4: memref<1x32xf32, #tpu.memory_space<vmem>>, %arg5: memref<1x32xf32, #tpu.memory_space<vmem>>, %arg6: memref<1x1xf32, #tpu.memory_space<vmem>>, %arg7: memref<2x32xf32, #tpu.memory_space<vmem>>) attributes {dimension_semantics = [#tpu.dimension_semantics<parallel>], iteration_bounds = array<i64: 1>, scalar_prefetch = 0 : i64, scratch_operands = 0 : i64, tpu.core_type = #tpu.core_type<tc>, window_params = [{transform_indices = @transform_0, window_bounds = array<i64: 3, 2, 32>}, {transform_indices = @transform_1, window_bounds = array<i64: 3, 2, 32>}, {pipeline_mode = #tpu.pipeline_mode<synchronous>, transform_indices = @transform_2, window_bounds = array<i64: 32, 32>}, {pipeline_mode = #tpu.pipeline_mode<synchronous>, transform_indices = @transform_3, window_bounds = array<i64: 1, 32>}, {pipeline_mode = #tpu.pipeline_mode<synchronous>, transform_indices = @transform_4, window_bounds = array<i64: 1, 32>}, {pipeline_mode = #tpu.pipeline_mode<synchronous>, transform_indices = @transform_5, window_bounds = array<i64: 1, 1>}, {transform_indices = @transform_6, window_bounds = array<i64: 2, 32>}]} {
    %c0 = arith.constant 0 : index
    %c0_0 = arith.constant 0 : index
    %0 = vector.load %arg3[%c0, %c0_0] : memref<32x32xf32, #tpu.memory_space<vmem>>, vector<32x32xf32>
    %c0_1 = arith.constant 0 : index
    %c0_2 = arith.constant 0 : index
    %1 = vector.load %arg4[%c0_1, %c0_2] : memref<1x32xf32, #tpu.memory_space<vmem>>, vector<1x32xf32>
    %c0_3 = arith.constant 0 : index
    %c0_4 = arith.constant 0 : index
    %2 = vector.load %arg5[%c0_3, %c0_4] : memref<1x32xf32, #tpu.memory_space<vmem>>, vector<1x32xf32>
    %c0_5 = arith.constant 0 : index
    %c0_6 = arith.constant 0 : index
    %3 = vector.load %arg6[%c0_5, %c0_6] : memref<1x1xf32, #tpu.memory_space<vmem>>, vector<1x1xf32>
    %c0_7 = arith.constant 0 : index
    %c0_8 = arith.constant 0 : index
    %c0_9 = arith.constant 0 : index
    %4 = vector.load %arg1[%c0_7, %c0_8, %c0_9] : memref<3x2x32xf32, #tpu.memory_space<vmem>>, vector<1x2x32xf32>
    %5 = vector.shape_cast %4 : vector<1x2x32xf32> to vector<2x32xf32>
    %c0_10 = arith.constant 0 : index
    %c0_11 = arith.constant 0 : index
    %c0_12 = arith.constant 0 : index
    %6 = vector.load %arg2[%c0_10, %c0_11, %c0_12] : memref<3x2x32xf32, #tpu.memory_space<vmem>>, vector<1x2x32xf32>
    %7 = vector.shape_cast %6 : vector<1x2x32xf32> to vector<2x32xf32>
    %cst = arith.constant dense<0.000000e+00> : vector<2x32xf32>
    %8 = tpu.matmul %5, %0, %cst {dimension_numbers = #tpu.dot_dimension_numbers<[1], [0], [0], [1], [0, 0, 1, 1], [], []>} : vector<2x32xf32>, vector<32x32xf32>, vector<2x32xf32> -> vector<2x32xf32>
    %9 = vector.broadcast %1 : vector<1x32xf32> to vector<2x32xf32>
    %10 = arith.addf %8, %9 : vector<2x32xf32>
    %cst_13 = arith.constant 0.000000e+00 : f32
    %11 = vector.broadcast %cst_13 : f32 to vector<2x32xf32>
    %12 = arith.maximumf %10, %11 : vector<2x32xf32>
    %13 = vector.broadcast %2 : vector<1x32xf32> to vector<2x32xf32>
    %14 = arith.mulf %12, %13 : vector<2x32xf32>
    %cst_14 = arith.constant dense<0.000000e+00> : vector<2xf32>
    %15 = vector.multi_reduction <add>, %14, %cst_14 [1] : vector<2x32xf32> to vector<2xf32>
    %16 = vector.shape_cast %15 : vector<2xf32> to vector<2x1xf32>
    %17 = vector.broadcast %3 : vector<1x1xf32> to vector<2x1xf32>
    %18 = arith.addf %16, %17 : vector<2x1xf32>
    %19 = math.exp %7 : vector<2x32xf32>
    %cst_15 = arith.constant dense<0.000000e+00> : vector<2xf32>
    %20 = vector.multi_reduction <add>, %19, %cst_15 [1] : vector<2x32xf32> to vector<2xf32>
    %21 = vector.shape_cast %20 : vector<2xf32> to vector<2x1xf32>
    %cst_16 = arith.constant 3.200000e+01 : f32
    %22 = vector.broadcast %cst_16 : f32 to vector<2x1xf32>
    %23 = arith.divf %21, %22 : vector<2x1xf32>
    %cst_17 = arith.constant 9.99999997E-7 : f32
    %24 = vector.broadcast %cst_17 : f32 to vector<2x1xf32>
    %25 = arith.addf %23, %24 : vector<2x1xf32>
    %26 = arith.divf %18, %25 : vector<2x1xf32>
    %c1 = arith.constant 1 : index
    %c0_18 = arith.constant 0 : index
    %c0_19 = arith.constant 0 : index
    %27 = vector.load %arg1[%c1, %c0_18, %c0_19] : memref<3x2x32xf32, #tpu.memory_space<vmem>>, vector<1x2x32xf32>
    %28 = vector.shape_cast %27 : vector<1x2x32xf32> to vector<2x32xf32>
    %c1_20 = arith.constant 1 : index
    %c0_21 = arith.constant 0 : index
    %c0_22 = arith.constant 0 : index
    %29 = vector.load %arg2[%c1_20, %c0_21, %c0_22] : memref<3x2x32xf32, #tpu.memory_space<vmem>>, vector<1x2x32xf32>
    %30 = vector.shape_cast %29 : vector<1x2x32xf32> to vector<2x32xf32>
    %cst_23 = arith.constant dense<0.000000e+00> : vector<2x32xf32>
    %31 = tpu.matmul %28, %0, %cst_23 {dimension_numbers = #tpu.dot_dimension_numbers<[1], [0], [0], [1], [0, 0, 1, 1], [], []>} : vector<2x32xf32>, vector<32x32xf32>, vector<2x32xf32> -> vector<2x32xf32>
    %32 = vector.broadcast %1 : vector<1x32xf32> to vector<2x32xf32>
    %33 = arith.addf %31, %32 : vector<2x32xf32>
    %cst_24 = arith.constant 0.000000e+00 : f32
    %34 = vector.broadcast %cst_24 : f32 to vector<2x32xf32>
    %35 = arith.maximumf %33, %34 : vector<2x32xf32>
    %36 = vector.broadcast %2 : vector<1x32xf32> to vector<2x32xf32>
    %37 = arith.mulf %35, %36 : vector<2x32xf32>
    %cst_25 = arith.constant dense<0.000000e+00> : vector<2xf32>
    %38 = vector.multi_reduction <add>, %37, %cst_25 [1] : vector<2x32xf32> to vector<2xf32>
    %39 = vector.shape_cast %38 : vector<2xf32> to vector<2x1xf32>
    %40 = vector.broadcast %3 : vector<1x1xf32> to vector<2x1xf32>
    %41 = arith.addf %39, %40 : vector<2x1xf32>
    %42 = math.exp %30 : vector<2x32xf32>
    %cst_26 = arith.constant dense<0.000000e+00> : vector<2xf32>
    %43 = vector.multi_reduction <add>, %42, %cst_26 [1] : vector<2x32xf32> to vector<2xf32>
    %44 = vector.shape_cast %43 : vector<2xf32> to vector<2x1xf32>
    %cst_27 = arith.constant 3.200000e+01 : f32
    %45 = vector.broadcast %cst_27 : f32 to vector<2x1xf32>
    %46 = arith.divf %44, %45 : vector<2x1xf32>
    %cst_28 = arith.constant 9.99999997E-7 : f32
    %47 = vector.broadcast %cst_28 : f32 to vector<2x1xf32>
    %48 = arith.addf %46, %47 : vector<2x1xf32>
    %49 = arith.divf %41, %48 : vector<2x1xf32>
    %c2 = arith.constant 2 : index
    %c0_29 = arith.constant 0 : index
    %c0_30 = arith.constant 0 : index
    %50 = vector.load %arg1[%c2, %c0_29, %c0_30] : memref<3x2x32xf32, #tpu.memory_space<vmem>>, vector<1x2x32xf32>
    %51 = vector.shape_cast %50 : vector<1x2x32xf32> to vector<2x32xf32>
    %c2_31 = arith.constant 2 : index
    %c0_32 = arith.constant 0 : index
    %c0_33 = arith.constant 0 : index
    %52 = vector.load %arg2[%c2_31, %c0_32, %c0_33] : memref<3x2x32xf32, #tpu.memory_space<vmem>>, vector<1x2x32xf32>
    %53 = vector.shape_cast %52 : vector<1x2x32xf32> to vector<2x32xf32>
    %cst_34 = arith.constant dense<0.000000e+00> : vector<2x32xf32>
    %54 = tpu.matmul %51, %0, %cst_34 {dimension_numbers = #tpu.dot_dimension_numbers<[1], [0], [0], [1], [0, 0, 1, 1], [], []>} : vector<2x32xf32>, vector<32x32xf32>, vector<2x32xf32> -> vector<2x32xf32>
    %55 = vector.broadcast %1 : vector<1x32xf32> to vector<2x32xf32>
    %56 = arith.addf %54, %55 : vector<2x32xf32>
    %cst_35 = arith.constant 0.000000e+00 : f32
    %57 = vector.broadcast %cst_35 : f32 to vector<2x32xf32>
    %58 = arith.maximumf %56, %57 : vector<2x32xf32>
    %59 = vector.broadcast %2 : vector<1x32xf32> to vector<2x32xf32>
    %60 = arith.mulf %58, %59 : vector<2x32xf32>
    %cst_36 = arith.constant dense<0.000000e+00> : vector<2xf32>
    %61 = vector.multi_reduction <add>, %60, %cst_36 [1] : vector<2x32xf32> to vector<2xf32>
    %62 = vector.shape_cast %61 : vector<2xf32> to vector<2x1xf32>
    %63 = vector.broadcast %3 : vector<1x1xf32> to vector<2x1xf32>
    %64 = arith.addf %62, %63 : vector<2x1xf32>
    %65 = math.exp %53 : vector<2x32xf32>
    %cst_37 = arith.constant dense<0.000000e+00> : vector<2xf32>
    %66 = vector.multi_reduction <add>, %65, %cst_37 [1] : vector<2x32xf32> to vector<2xf32>
    %67 = vector.shape_cast %66 : vector<2xf32> to vector<2x1xf32>
    %cst_38 = arith.constant 3.200000e+01 : f32
    %68 = vector.broadcast %cst_38 : f32 to vector<2x1xf32>
    %69 = arith.divf %67, %68 : vector<2x1xf32>
    %cst_39 = arith.constant 9.99999997E-7 : f32
    %70 = vector.broadcast %cst_39 : f32 to vector<2x1xf32>
    %71 = arith.addf %69, %70 : vector<2x1xf32>
    %72 = arith.divf %64, %71 : vector<2x1xf32>
    %73 = arith.maximumf %26, %49 : vector<2x1xf32>
    %74 = arith.maximumf %73, %72 : vector<2x1xf32>
    %75 = arith.subf %26, %74 : vector<2x1xf32>
    %76 = math.exp %75 : vector<2x1xf32>
    %77 = arith.subf %49, %74 : vector<2x1xf32>
    %78 = math.exp %77 : vector<2x1xf32>
    %79 = arith.subf %72, %74 : vector<2x1xf32>
    %80 = math.exp %79 : vector<2x1xf32>
    %81 = arith.addf %76, %78 : vector<2x1xf32>
    %82 = arith.addf %81, %80 : vector<2x1xf32>
    %cst_40 = arith.constant 1.000000e+00 : f32
    %83 = vector.broadcast %cst_40 : f32 to vector<2x1xf32>
    %84 = arith.divf %83, %82 : vector<2x1xf32>
    %85 = arith.mulf %76, %84 : vector<2x1xf32>
    %86 = vector.broadcast %85 : vector<2x1xf32> to vector<2x32xf32>
    %87 = arith.mulf %86, %5 : vector<2x32xf32>
    %88 = arith.mulf %78, %84 : vector<2x1xf32>
    %89 = vector.broadcast %88 : vector<2x1xf32> to vector<2x32xf32>
    %90 = arith.mulf %89, %28 : vector<2x32xf32>
    %91 = arith.addf %87, %90 : vector<2x32xf32>
    %92 = arith.mulf %80, %84 : vector<2x1xf32>
    %93 = vector.broadcast %92 : vector<2x1xf32> to vector<2x32xf32>
    %94 = arith.mulf %93, %51 : vector<2x32xf32>
    %95 = arith.addf %91, %94 : vector<2x32xf32>
    %c0_41 = arith.constant 0 : index
    %c0_42 = arith.constant 0 : index
    %96 = vector.load %arg7[%c0_41, %c0_42] : memref<2x32xf32, #tpu.memory_space<vmem>>, vector<2x32xf32>
    tpu.vector_store %arg7[%c0_41, %c0_42], %95 {strides = array<i32>} : memref<2x32xf32, #tpu.memory_space<vmem>>, vector<2x32xf32>,
    return
  }
  func.func @transform_0(%arg0: i32) -> (i32, i32, i32) {
    %c0_i32 = arith.constant 0 : i32
    %c0_i32_0 = arith.constant 0 : i32
    %c0_i32_1 = arith.constant 0 : i32
    return %c0_i32, %arg0, %c0_i32_0 : i32, i32, i32
  }
  func.func @transform_1(%arg0: i32) -> (i32, i32, i32) {
    %c0_i32 = arith.constant 0 : i32
    %c0_i32_0 = arith.constant 0 : i32
    %c0_i32_1 = arith.constant 0 : i32
    return %c0_i32, %arg0, %c0_i32_0 : i32, i32, i32
  }
  func.func @transform_2(%arg0: i32) -> (i32, i32) {
    %c0_i32 = arith.constant 0 : i32
    %c0_i32_0 = arith.constant 0 : i32
    %c0_i32_1 = arith.constant 0 : i32
    return %c0_i32, %c0_i32_0 : i32, i32
  }
  func.func @transform_3(%arg0: i32) -> (i32, i32) {
    %c0_i32 = arith.constant 0 : i32
    %c0_i32_0 = arith.constant 0 : i32
    %c0_i32_1 = arith.constant 0 : i32
    return %c0_i32, %c0_i32_0 : i32, i32
  }
  func.func @transform_4(%arg0: i32) -> (i32, i32) {
    %c0_i32 = arith.constant 0 : i32
    %c0_i32_0 = arith.constant 0 : i32
    %c0_i32_1 = arith.constant 0 : i32
    return %c0_i32, %c0_i32_0 : i32, i32
  }
  func.func @transform_5(%arg0: i32) -> (i32, i32) {
    %c0_i32 = arith.constant 0 : i32
    %c0_i32_0 = arith.constant 0 : i32
    %c0_i32_1 = arith.constant 0 : i32
    return %c0_i32, %c0_i32_0 : i32, i32
  }
  func.func @transform_6(%arg0: i32) -> (i32, i32) {
    %c0_i32 = arith.constant 0 : i32
    %c0_i32_0 = arith.constant 0 : i32
    return %arg0, %c0_i32 : i32, i32
  }
}

</mosaic_0001>

<bundles_post_ra>
// kernel: tpu_custom_call.1
= control target key start
LH: loop header
LB: loop body
LE: loop exit
PB: predicated region body
PF: predicated region fallthrough
CT: control target
= control target key end

     0   :  { %s712_s0 = inlined_call_operand.hbm [shape: f32[3,2,32], index: 0, kind: input, shape index: {}]   ;;  %s713_s1 = inlined_call_operand.vmem [shape: f32[3,2,32], index: 1, kind: input, shape index: {}]   ;;  %s714_s2 = inlined_call_operand.hbm [shape: f32[32,32], index: 2, kind: input, shape index: {}]   ;;  %s715_s3 = inlined_call_operand.vmem [shape: f32[1,32], index: 3, kind: input, shape index: {}]   ;;  %s716_s4 = inlined_call_operand.vmem [shape: f32[1,32], index: 4, kind: input, shape index: {}]   ;;  %s717_s5 = inlined_call_operand.<no memory space> [shape: f32[1,1], index: 5, kind: input, shape index: {}]   ;;  %s718_s6 = inlined_call_operand.hbm [shape: f32[2,32], index: 6, kind: output, shape index: {}]  }
   0x1   :  { %v11_v0 = vstv %s717_s5 }
   0x2   :  { %12 = vst [vmem:[#allocation2] sm:$0x1] %v11_v0 }
   0x3   :  { %13 = vsyncpa [#allocation4], 0 }
   0x4   :  { %14 = vsyncpa [#allocation7], 0 }
   0x5   :  { %15 = vsyncpa [#allocation5], 0  ;;  %s590_s23 = smov [#allocation3]   ;;  %s518_s27 = scalar_lea.hbm %s712_s0, 96 }
   0x6   :  { %s21_s24 = sshll.u32 %s590_s23, 4  ;;  %p519_p0 = scmp.ne.s32.totalorder %s712_s0, %s518_s27  ;;  %s22_s24 = int_to_ptr.vmem [resolvable:$true] %s21_s24 }
   0x7   :  { %p522_p1 = scmp.lt.u32.totalorder %s518_s27, %s712_s0 }
   0x9   :  { %p524_p2 = pnand %p522_p1, %p519_p0 }
   0xb   :  { %527 = shalt.err (!%p524_p2)
}
   0xc   :  { %s528_s5 = scalar_lea.vmem %s22_s24, 96  ;;  %p533_p4 = scmp.lt.s32.totalorder %s22_s24, %s22_s24 }
   0xd   :  { %p529_p3 = scmp.ne.s32.totalorder %s22_s24, %s528_s5  ;;  %p534_p5 = scmp.lt.s32.totalorder %s528_s5, %s528_s5 }
   0xf   :  { %p535_p6 = por %p534_p5, %p533_p4 }
  0x11   :  { %p536_p7 = pnand %p535_p6, %p529_p3 }
  0x13   :  { %539 = shalt.err (!%p536_p7)
}
  0x14   :  { %s591_s8 = smov 32   ;;  %s592_s9 = smov 2  }
  0x15   :  { %27 = dma.hbm_to_vmem [thread:$0]  %s712_s0, 96, %s22_s24, [#allocation4], %s591_s8, %s591_s8, %s592_s9  }
  0x16   :  { %s593_s12 = smov [#allocation6]   ;;  %s540_s16 = scalar_lea.hbm %s714_s2, 512 }
  0x17   :  { %s35_s13 = sshll.u32 %s593_s12, 4  ;;  %p541_p8 = scmp.ne.s32.totalorder %s714_s2, %s540_s16  ;;  %s36_s13 = int_to_ptr.vmem [resolvable:$true] %s35_s13 }
  0x18   :  { %p544_p9 = scmp.lt.u32.totalorder %s540_s16, %s714_s2 }
  0x1a   :  { %p546_p10 = pnand %p544_p9, %p541_p8 }
  0x1c   :  { %549 = shalt.err (!%p546_p10)
}
  0x1d   :  { %s550_s21 = scalar_lea.vmem %s36_s13, 512  ;;  %p555_p12 = scmp.lt.s32.totalorder %s36_s13, %s36_s13 }
  0x1e   :  { %p551_p11 = scmp.ne.s32.totalorder %s36_s13, %s550_s21  ;;  %p556_p13 = scmp.lt.s32.totalorder %s550_s21, %s550_s21 }
  0x20   :  { %p557_p0 = por %p556_p13, %p555_p12 }
  0x22   :  { %p558_p1 = pnand %p557_p0, %p551_p11 }
  0x24   :  { %561 = shalt.err (!%p558_p1)
}
  0x25   :  { %s594_s0 = smov 128   ;;  %s595_s22 = smov 8  }
  0x26   :  { %41 = dma.hbm_to_vmem [thread:$0]  %s714_s2, 512, %s36_s13, [#allocation7], %s594_s0, %s594_s0, %s595_s22  }
  0x27   :  { %584 = dma.done.wait [#allocation4], 96  }
  0x28   :  { %585 = vsyncadd [#allocation4], 4294967200 }
  0x29   :  { %586 = dma.done.wait [#allocation7], 512  }
  0x2a   :  { %587 = vsyncadd [#allocation7], 4294966784  ;;  %v596_v1 = vmov 0.0|0.0   ;;  %vm597_vm0 = vmmov 0   ;;  %v598_v2 = vmov 0.0   ;;  %v54_v3 = vld [vmem:[#allocation6] sm:$0xff] }
  0x2b   :  { %467 = vmatprep.subr.bf16.mxu0 %v596_v1  ;;  %473 = vmatprep.subr.bf16.mxu1 %v596_v1  ;;  %v55_v4 = vld [vmem:[#allocation6 + $0x8] sm:$0xff]  ;;  %v56_v5 = vld [vmem:[#allocation6 + $0x10] sm:$0xff]  ;;  %v57_v7 = vld [vmem:[#allocation6 + $0x18] sm:$0xff]  ;;  %vm69_vm1 = vcmask 261120   ;;  %vm151_vm2 = vcmask 254976   ;;  %v599_v44 = vmov 0  }
  0x2c   :  { %442 = vmatprep.mubr.msk.f32.mxu0 %vm597_vm0, %v598_v2  ;;  %453 = vmatprep.mubr.msk.f32.mxu1 %vm597_vm0, %v598_v2  ;;  %v468_v6 = vpack.c.bf16 %v55_v4, %v54_v3  ;;  %v62_v8 = vld [vmem:[%s713_s1] sm:$0x3]  ;;  %v415_v9 = vld [vmem:[%s713_s1 + $0x2] sm:$0x3]  ;;  %v471_v10 = vpack.c.bf16 %v57_v7, %v56_v5  ;;  %v678_v16 = vld [vmem:[#allocation3 + $0x4] sm:$0x3] }
  0x2d   :  { %v162_v11 = vmul.f32 1.442695, %v62_v8  ;;  %v255_v12 = vmul.f32 1.442695, %v415_v9  ;;  %v671_v13 = vld [vmem:[#allocation3] sm:$0x3]  ;;  %497 = vset.pattern.permute.xlu1 %v599_v44  ;;  %496 = vset.pattern.permute.xlu0 %v599_v44 }
  0x2e   :  { %469 = vmatpush3.bf16.msra.mxu0 %v468_v6  ;;  %475 = vmatpush3.bf16.msra.mxu1 %v468_v6  ;;  %v673_v14 = vld [vmem:[#allocation3 + $0x2] sm:$0x3]  ;;  %v411_v24 = vld [vmem:[%s715_s3] ss:$0 sm:$0xff] }
  0x2f   :  { %470 = vmatprep.subr.bf16.mxu0 %v596_v1  ;;  %476 = vmatprep.subr.bf16.mxu1 %v596_v1  ;;  %498 = vpow2.f32 %v162_v11  ;;  %v417_v20 = vld [vmem:[%s713_s1 + $0x4] sm:$0x3]  ;;  %v413_v31 = vld [vmem:[%s716_s4] ss:$0 sm:$0xff]  ;;  %s600_s1 = smov [#allocation8]  }
  0x30   :  { %500 = vpow2.f32 %v255_v12  ;;  %v347_v21 = vmul.f32 1.442695, %v417_v20  ;;  %v414_v54 = vld [vmem:[#allocation2] ss:$0 sm:$0xff]  ;;  %s401_s3 = sshll.u32 %s600_s1, 4  ;;  %s402_s3 = int_to_ptr.vmem [resolvable:$true] %s401_s3 }
  0x31   :  { %s562_s4 = scalar_lea.vmem %s402_s3, 32  ;;  %p567_p3 = scmp.lt.s32.totalorder %s402_s3, %s402_s3 }
  0x32   :  { %472 = vmatpush3.bf16.msra.mxu0 %v471_v10  ;;  %478 = vmatpush3.bf16.msra.mxu1 %v471_v10  ;;  %502 = vpow2.f32 %v347_v21  ;;  %p563_p2 = scmp.ne.s32.totalorder %s402_s3, %s562_s4  ;;  %p568_p4 = scmp.lt.s32.totalorder %s562_s4, %s562_s4 }
  0x33   :  { %479 = vmatprep.subr.bf16.mxu0 %v596_v1 }
  0x34   :  { %p569_p5 = por %p568_p4, %p567_p3 }
  0x35   :  { %443 = vmatmul.mubr.msk.f32.vlgmr.msra.gmra.mrb[0].mxu0 %vm69_vm1, %v671_v13  ;;  %454 = vmatmul.mubr.msk.f32.vlgmr.msra.gmra.mrb[0].mxu1 %vm69_vm1, %v673_v14 }
  0x36   :  { %481 = vmatpush3.bf16.msra.mxu0 %v468_v6  ;;  %464 = vmatprep.mubr.msk.f32.mxu0 %vm597_vm0, %v598_v2  ;;  %p570_p6 = pnand %p569_p5, %p563_p2 }
  0x37   :  { %482 = vmatprep.subr.bf16.mxu0 %v596_v1 }
  0x39   :  { %v499_v15 = vpop.eup %498 }
  0x3a   :  { %484 = vmatpush3.bf16.msra.mxu0 %v471_v10  ;;  %v501_v17 = vpop.eup %500  ;;  %v164_v18 = vsel %vm151_vm2, %v499_v15, 0.0 }
  0x3b   :  { %165 = vadd.xlane.f32.xlu0 %v164_v18  ;;  %v257_v19 = vsel %vm151_vm2, %v501_v17, 0.0 }
  0x3c   :  { %v503_v22 = vpop.eup %502 }
  0x3d   :  { %465 = vmatmul.mubr.msk.f32.vlgmr.msra.gmra.mrb[2].mxu0 %vm69_vm1, %v678_v16  ;;  %v349_v23 = vsel %vm151_vm2, %v503_v22, 0.0 }
  0x3e   :  { %350 = vadd.xlane.f32.xlu1 %v349_v23 }
  0x3f   :  { %258 = vadd.xlane.f32.xlu0 %v257_v19 }
  0xc8   :  { %v166_v45 = vpop.xlane.xlu0 %165 }
  0xc9   :  { %v168_v47 = vmul.f32 0.03125, %v166_v45 }
  0xcb   :  { %v351_v49 = vpop.xlane.xlu1 %350  ;;  %v169_v50 = vadd.f32 1e-06, %v168_v47 }
  0xcc   :  { %v259_v46 = vpop.xlane.xlu0 %258  ;;  %v352_v52 = vmul.f32 0.03125, %v351_v49 }
  0xcd   :  { %v260_v48 = vmul.f32 0.03125, %v259_v46  ;;  %504 = vrcp.f32 %v169_v50 }
  0xce   :  { %v353_v53 = vadd.f32 1e-06, %v352_v52 }
  0xcf   :  { %v261_v51 = vadd.f32 1e-06, %v260_v48 }
  0xd1   :  { %506 = vrcp.f32 %v261_v51 }
  0xd2   :  { %508 = vrcp.f32 %v353_v53 }
  0xd7   :  { %v505_v57 = vpop.eup %504 }
  0xdb   :  { %v507_v60 = vpop.eup %506 }
  0xdc   :  { %v509_v63 = vpop.eup %508 }
 0x108   :  { %v139_v25 = vpop.f32.mrb[0].mxu0  ;;  %v245_v26 = vpop.f32.mrb[0].mxu1 }
 0x109   :  { %v140_v27 = vadd.f32 %v411_v24, %v139_v25  ;;  %v444_v28 = vpop.f32.mrb[1].mxu0  ;;  %v246_v29 = vadd.f32 %v411_v24, %v245_v26  ;;  %v455_v30 = vpop.f32.mrb[1].mxu1 }
 0x10b   :  { %v143_v32 = vmax.f32 %v140_v27, 0.0  ;;  %v249_v33 = vmax.f32 %v246_v29, 0.0 }
 0x10d   :  { %v250_v34 = vmul.f32 %v413_v31, %v249_v33  ;;  %v150_v35 = vmul.f32 %v413_v31, %v143_v32 }
 0x10f   :  { %v251_v36 = vsel %vm151_vm2, %v250_v34, 0.0  ;;  %v152_v37 = vsel %vm151_vm2, %v150_v35, 0.0 }
 0x110   :  { %v337_v38 = vpop.f32.mrb[2].mxu0  ;;  %252 = vadd.xlane.f32.xlu0 %v251_v36  ;;  %153 = vadd.xlane.f32.xlu1 %v152_v37 }
 0x111   :  { %v338_v39 = vadd.f32 %v411_v24, %v337_v38  ;;  %v466_v40 = vpop.f32.mrb[3].mxu0 }
 0x113   :  { %v341_v41 = vmax.f32 %v338_v39, 0.0 }
 0x115   :  { %v342_v42 = vmul.f32 %v413_v31, %v341_v41 }
 0x117   :  { %v343_v43 = vsel %vm151_vm2, %v342_v42, 0.0 }
 0x118   :  { %344 = vadd.xlane.f32.xlu1 %v343_v43 }
 0x19d   :  { %v253_v55 = vpop.xlane.xlu0 %252  ;;  %v154_v56 = vpop.xlane.xlu1 %153 }
 0x19e   :  { %v254_v58 = vadd.f32 %v414_v54, %v253_v55  ;;  %v161_v59 = vadd.f32 %v414_v54, %v154_v56 }
 0x1a0   :  { %v263_v61 = vmul.f32 %v507_v60, %v254_v58  ;;  %v171_v62 = vmul.f32 %v505_v57, %v161_v59 }
 0x1a2   :  { %v356_v2 = vmax.f32 %v171_v62, %v263_v61 }
 0x1a5   :  { %v345_v0 = vpop.xlane.xlu1 %344 }
 0x1a6   :  { %v346_v1 = vadd.f32 %v414_v54, %v345_v0 }
 0x1a8   :  { %v355_v3 = vmul.f32 %v509_v63, %v346_v1 }
 0x1aa   :  { %v357_v4 = vmax.f32 %v356_v2, %v355_v3 }
 0x1ac   :  { %v358_v5 = vsub.f32 %v171_v62, %v357_v4  ;;  %v361_v6 = vsub.f32 %v263_v61, %v357_v4  ;;  %v364_v7 = vsub.f32 %v355_v3, %v357_v4 }
 0x1ae   :  { %v359_v8 = vmul.f32 1.442695, %v358_v5  ;;  %v362_v9 = vmul.f32 1.442695, %v361_v6  ;;  %v365_v10 = vmul.f32 1.442695, %v364_v7 }
 0x1b0   :  { %510 = vpow2.f32 %v359_v8 }
 0x1b1   :  { %512 = vpow2.f32 %v362_v9 }
 0x1b2   :  { %514 = vpow2.f32 %v365_v10 }
 0x1ba   :  { %v511_v11 = vpop.eup %510 }
 0x1bb   :  { %v513_v12 = vpop.eup %512 }
 0x1bc   :  { %v367_v15 = vadd.f32 %v513_v12, %v511_v11  ;;  %v515_v17 = vpop.eup %514 }
 0x1be   :  { %v368_v18 = vadd.f32 %v515_v17, %v367_v15 }
 0x1c0   :  { %516 = vrcp.f32 %v368_v18 }
 0x1ca   :  { %v517_v19 = vpop.eup %516 }
 0x1cb   :  { %v378_v20 = vmul.f32 %v517_v19, %v513_v12  ;;  %v371_v21 = vmul.f32 %v517_v19, %v511_v11  ;;  %v386_v22 = vmul.f32 %v517_v19, %v515_v17 }
 0x1cd   :  { %381 = vperm.xlu1 %497, %v378_v20   ;;  %374 = vperm.xlu0 %496, %v371_v21  }
 0x1d1   :  { %389 = vperm.xlu1 %497, %v386_v22  }
 0x24c   :  { %v382_v23 = vpop.permute.xlu1 %381  ;;  %v375_v24 = vpop.permute.xlu0 %374 }
 0x24d   :  { %v384_v25 = vmul.f32 %v382_v23, %v673_v14  ;;  %v377_v26 = vmul.f32 %v375_v24, %v671_v13 }
 0x24f   :  { %v385_v28 = vadd.f32 %v384_v25, %v377_v26 }
 0x250   :  { %v390_v27 = vpop.permute.xlu1 %389 }
 0x251   :  { %v392_v29 = vmul.f32 %v390_v27, %v678_v16 }
 0x253   :  { %v393_v30 = vadd.f32 %v392_v29, %v385_v28 }
 0x255   :  { %394 = vst.msk [vmem:[#allocation8] sm:$0x3] %vm151_vm2, %v393_v30 }
 0x256   :  { %573 = shalt.err (!%p570_p6)
}
 0x257   :  { %s574_s11 = scalar_lea.hbm %s718_s6, 32 }
 0x258   :  { %p575_p7 = scmp.ne.s32.totalorder %s718_s6, %s574_s11  ;;  %p578_p8 = scmp.lt.u32.totalorder %s574_s11, %s718_s6 }
 0x25a   :  { %p580_p9 = pnand %p578_p8, %p575_p7 }
 0x25c   :  { %583 = shalt.err (!%p580_p9)
}
 0x25d   :  { %404 = dma.vmem_to_hbm [thread:$0]  %s402_s3, 32, %s718_s6, [#allocation5]  }
 0x25e   :  { %588 = dma.done.wait [#allocation5], 32  }
 0x25f   :  { %589 = vsyncadd [#allocation5], 4294967264 }
 0x260   :  { %408 = vsyncpa [#allocation4], 1 }
 0x261   :  { %409 = vsyncpa [#allocation7], 1 }
 0x262   :  { %410 = vsyncpa [#allocation5], 1 }

</bundles_post_ra>
